<compile_context>
chip_gen: v6e
topology: v6e:2x2x1
jax: 0.10.0
libtpu: 0.0.40
codegen_flags: <defaults>
</compile_context>

<pallas_src>
from functools import partial

import jax
import jax.numpy as jnp
from jax.experimental import pallas as pl
from jax.experimental.pallas import tpu as pltpu


def _ensemble_kernel(x_ref, w_ref, b_ref, out_ref, pooled_acc,
                     *, avg_mode, n_models, k_pad, inv_hw, thw):
    # Grid: (B tiles [parallel], HW tiles [arbitrary reduction, last axis]).
    #   x_ref      : [tB, C, thw]      current spatial tile of the input
    #   w_ref      : [C, Dout]         fused classifier weights (resident)
    #   b_ref      : [1, Dout]         fused biases
    #   out_ref    : [tB, Kp]          ensemble clipwise_output (lane-dense)
    #   pooled_acc : [tB, C, 128] f32  running per-lane partial sums of x
    k = pl.program_id(1)

    @pl.when(k == 0)
    def _init():
        pooled_acc[...] = jnp.zeros_like(pooled_acc)

    # ---- spatial pooling: VPU adds over 128-lane chunks (no per-tile XLU reduce)
    x = x_ref[...]
    if x.dtype != jnp.float32:
        x = x.astype(jnp.float32)
    acc = pooled_acc[...]
    for j in range(thw // 128):                       # static unroll, lane-aligned
        acc = acc + x[:, :, j * 128:(j + 1) * 128]
    pooled_acc[...] = acc

    # ---- finalize: one XLU reduce, ONE fused matmul, ensemble combine, store
    @pl.when(k == pl.num_programs(1) - 1)
    def _finalize():
        pooled = jnp.sum(pooled_acc[...], axis=-1) * inv_hw          # [tB, C]
        logits = jnp.dot(pooled, w_ref[...],
                         preferred_element_type=jnp.float32) + b_ref[...]  # [tB, Dout]
        if avg_mode == "mean":
            # Weights were pre-averaged over the N models -> single sigmoid.
            out_ref[...] = jax.nn.sigmoid(logits)
        else:  # geomean: Dout == n_models * k_pad, static lane-aligned slices
            prod = None
            for m in range(n_models):
                s = jax.nn.sigmoid(logits[:, m * k_pad:(m + 1) * k_pad]) + 1e-8
                prod = s if prod is None else prod * s
            out_ref[...] = prod ** (1.0 / float(n_models))


def ensemble_forward(x, weights, biases, avg_mode="mean"):
    """Pallas ensemble forward. Returns {'clipwise_output': [B, K] f32}."""
    B, C, H, W = x.shape
    N, C2, K = weights.shape
    assert C2 == C and biases.shape == (N, K)
    if avg_mode not in ("mean", "geomean"):
        raise ValueError(f"Unsupported {avg_mode}")

    HW = H * W
    f32 = jnp.float32

    # ---- fuse per-model classifier weights so the kernel issues ONE matmul
    k_pad = ((K + 127) // 128) * 128                  # lane-dense output width
    w32 = weights.astype(f32)
    b32 = biases.astype(f32)
    if avg_mode == "mean":
        # sigmoid(mean_m(p @ W_m + b_m)) == sigmoid(p @ mean(W) + mean(b))
        w_f = jnp.zeros((C, k_pad), f32).at[:, :K].set(jnp.mean(w32, axis=0))
        b_f = jnp.zeros((1, k_pad), f32).at[:, :K].set(jnp.mean(b32, axis=0))
    else:
        w_p = jnp.zeros((N, C, k_pad), f32).at[:, :, :K].set(w32)    # [N, C, Kp]
        w_f = jnp.transpose(w_p, (1, 0, 2)).reshape(C, N * k_pad)    # [C, N*Kp]
        b_f = jnp.zeros((N, k_pad), f32).at[:, :K].set(b32).reshape(1, N * k_pad)
    d_out = w_f.shape[1]

    # ---- tile the spatial axis (reduction, last grid axis) and the batch
    hw_p = ((HW + 127) // 128) * 128
    if hw_p >= 4096 and hw_p % 1024 == 0:
        thw = 1024
    elif hw_p >= 2048 and hw_p % 512 == 0:
        thw = 512
    else:
        thw = 128
    tb = 8 if B % 8 == 0 else B

    x3 = x.reshape(B, C, HW)                          # keep native dtype (no f32 copy)
    if hw_p != HW:
        # Zero padding does not perturb the sum; we divide by the true HW.
        x3 = jnp.pad(x3, ((0, 0), (0, 0), (0, hw_p - HW)))
    grid = (B // tb, hw_p // thw)

    kernel = partial(_ensemble_kernel, avg_mode=avg_mode, n_models=N,
                     k_pad=k_pad, inv_hw=1.0 / float(HW), thw=thw)

    bytes_x = int(x3.size) * x3.dtype.itemsize
    cost = pl.CostEstimate(
        flops=int(2 * B * C * d_out + B * C * hw_p),
        transcendentals=int(B * d_out),
        bytes_accessed=int(bytes_x + (w_f.size + b_f.size + B * k_pad) * 4),
    )

    out = pl.pallas_call(
        kernel,
        out_shape=jax.ShapeDtypeStruct((B, k_pad), f32),
        grid_spec=pltpu.PrefetchScalarGridSpec(
            num_scalar_prefetch=0,
            grid=grid,
            in_specs=[
                pl.BlockSpec((tb, C, thw), lambda i, k: (i, 0, k)),
                pl.BlockSpec((C, d_out), lambda i, k: (0, 0)),
                pl.BlockSpec((1, d_out), lambda i, k: (0, 0)),
            ],
            out_specs=pl.BlockSpec((tb, k_pad), lambda i, k: (i, 0)),
            scratch_shapes=[pltpu.VMEM((tb, C, 128), f32)],
        ),
        compiler_params=pltpu.CompilerParams(
            dimension_semantics=("parallel", "arbitrary"),
        ),
        cost_estimate=cost,
    )(x3, w_f, b_f)

    # Slice padded lanes off (lane-dense store inside the kernel, cheap slice here).
    return {"clipwise_output": out[:, :K]}


def ensemble_reference(x, weights, biases, avg_mode="mean"):
    """Pure-JAX reference matching the PyTorch semantics."""
    B, C, H, W = x.shape
    pooled = jnp.mean(x.reshape(B, C, H * W).astype(jnp.float32), axis=-1)     # [B, C]
    logits = jnp.einsum("bc,nck->nbk", pooled, weights) + biases[:, None, :]   # [N, B, K]
    n = weights.shape[0]
    if avg_mode == "mean":
        return jax.nn.sigmoid(jnp.mean(logits, axis=0))
    elif avg_mode == "geomean":
        return jnp.prod(jax.nn.sigmoid(logits) + 1e-8, axis=0) ** (1.0 / n)
    else:
        raise ValueError(f"Unsupported {avg_mode}")


if __name__ == "__main__":
    # Small deterministic setup.
    B, C, H, W = 2, 4, 16, 16
    N_MODELS, NUM_CLASSES = 3, 24

    key = jax.random.PRNGKey(0)
    kx, kw, kb = jax.random.split(key, 3)
    x = jax.random.normal(kx, (B, C, H, W), dtype=jnp.float32)
    weights = 0.1 * jax.random.normal(kw, (N_MODELS, C, NUM_CLASSES), dtype=jnp.float32)
    biases = 0.1 * jax.random.normal(kb, (N_MODELS, NUM_CLASSES), dtype=jnp.float32)

    # TODO(synk): the real sub-models are arbitrary nn.Modules; here each is a
    # pool+linear head whose weights are fused into the single Pallas kernel.
    ok = True
    for mode in ("mean", "geomean"):
        out = ensemble_forward(x, weights, biases, avg_mode=mode)["clipwise_output"]
        out = jax.block_until_ready(out)
        ref = ensemble_reference(x, weights, biases, avg_mode=mode)
        if not jnp.allclose(out, ref, atol=1e-5, rtol=1e-5):
            ok = False
            print(f"MISMATCH in mode={mode}: max err "
                  f"{float(jnp.max(jnp.abs(out - ref)))}")

    if ok:
        print("KERNEL_OK")
</pallas_src>

<mosaic_0001>
module attributes {stable_mosaic.version = 11 : i64} {
  func.func @_ensemble_kernel(%arg0: i32, %arg1: i32, %arg2: memref<2x4x128xf32, #tpu.memory_space<vmem>>, %arg3: memref<4x128xf32, #tpu.memory_space<vmem>>, %arg4: memref<1x128xf32, #tpu.memory_space<vmem>>, %arg5: memref<2x128xf32, #tpu.memory_space<vmem>>, %arg6: memref<2x4x128xf32, #tpu.memory_space<vmem>>) attributes {dimension_semantics = [#tpu.dimension_semantics<parallel>, #tpu.dimension_semantics<arbitrary>], iteration_bounds = array<i64: 1, 2>, scalar_prefetch = 0 : i64, scratch_operands = 1 : i64, tpu.core_type = #tpu.core_type<tc>, window_params = [{transform_indices = @transform_0, window_bounds = array<i64: 2, 4, 128>}, {pipeline_mode = #tpu.pipeline_mode<synchronous>, transform_indices = @transform_1, window_bounds = array<i64: 4, 128>}, {pipeline_mode = #tpu.pipeline_mode<synchronous>, transform_indices = @transform_2, window_bounds = array<i64: 1, 128>}, {transform_indices = @transform_3, window_bounds = array<i64: 2, 128>}]} {
    %c0_i32 = arith.constant 0 : i32
    %0 = arith.cmpi eq, %arg1, %c0_i32 : i32
    %1 = arith.extui %0 : i1 to i32
    %c0_i32_0 = arith.constant 0 : i32
    %2 = arith.cmpi ne, %1, %c0_i32_0 : i32
    scf.if %2 {
      %cst = arith.constant 0.000000e+00 : f32
      %10 = vector.broadcast %cst : f32 to vector<2x4x128xf32>
      %c0_10 = arith.constant 0 : index
      %c0_11 = arith.constant 0 : index
      %c0_12 = arith.constant 0 : index
      %11 = vector.load %arg6[%c0_10, %c0_11, %c0_12] : memref<2x4x128xf32, #tpu.memory_space<vmem>>, vector<2x4x128xf32>
      tpu.vector_store %arg6[%c0_10, %c0_11, %c0_12], %10 {strides = array<i32>} : memref<2x4x128xf32, #tpu.memory_space<vmem>>, vector<2x4x128xf32>,
    } else {
    }
    %c0 = arith.constant 0 : index
    %c0_1 = arith.constant 0 : index
    %c0_2 = arith.constant 0 : index
    %3 = vector.load %arg2[%c0, %c0_1, %c0_2] : memref<2x4x128xf32, #tpu.memory_space<vmem>>, vector<2x4x128xf32>
    %c0_3 = arith.constant 0 : index
    %c0_4 = arith.constant 0 : index
    %c0_5 = arith.constant 0 : index
    %4 = vector.load %arg6[%c0_3, %c0_4, %c0_5] : memref<2x4x128xf32, #tpu.memory_space<vmem>>, vector<2x4x128xf32>
    %5 = arith.addf %4, %3 : vector<2x4x128xf32>
    %c0_6 = arith.constant 0 : index
    %c0_7 = arith.constant 0 : index
    %c0_8 = arith.constant 0 : index
    %6 = vector.load %arg6[%c0_6, %c0_7, %c0_8] : memref<2x4x128xf32, #tpu.memory_space<vmem>>, vector<2x4x128xf32>
    tpu.vector_store %arg6[%c0_6, %c0_7, %c0_8], %5 {strides = array<i32>} : memref<2x4x128xf32, #tpu.memory_space<vmem>>, vector<2x4x128xf32>,
    %c1_i32 = arith.constant 1 : i32
    %7 = arith.cmpi eq, %arg1, %c1_i32 : i32
    %8 = arith.extui %7 : i1 to i32
    %c0_i32_9 = arith.constant 0 : i32
    %9 = arith.cmpi ne, %8, %c0_i32_9 : i32
    scf.if %9 {
      %c0_10 = arith.constant 0 : index
      %c0_11 = arith.constant 0 : index
      %c0_12 = arith.constant 0 : index
      %10 = vector.load %arg6[%c0_10, %c0_11, %c0_12] : memref<2x4x128xf32, #tpu.memory_space<vmem>>, vector<2x4x128xf32>
      %cst = arith.constant dense<0.000000e+00> : vector<2x4xf32>
      %11 = vector.multi_reduction <add>, %10, %cst [2] : vector<2x4x128xf32> to vector<2x4xf32>
      %cst_13 = arith.constant 3.906250e-03 : f32
      %12 = vector.broadcast %cst_13 : f32 to vector<2x4xf32>
      %13 = arith.mulf %11, %12 : vector<2x4xf32>
      %c0_14 = arith.constant 0 : index
      %c0_15 = arith.constant 0 : index
      %14 = vector.load %arg3[%c0_14, %c0_15] : memref<4x128xf32, #tpu.memory_space<vmem>>, vector<4x128xf32>
      %cst_16 = arith.constant dense<0.000000e+00> : vector<2x128xf32>
      %15 = tpu.matmul %13, %14, %cst_16 {dimension_numbers = #tpu.dot_dimension_numbers<[1], [0], [0], [1], [0, 0, 1, 1], [], []>} : vector<2x4xf32>, vector<4x128xf32>, vector<2x128xf32> -> vector<2x128xf32>
      %c0_17 = arith.constant 0 : index
      %c0_18 = arith.constant 0 : index
      %16 = vector.load %arg4[%c0_17, %c0_18] : memref<1x128xf32, #tpu.memory_space<vmem>>, vector<1x128xf32>
      %17 = vector.broadcast %16 : vector<1x128xf32> to vector<2x128xf32>
      %18 = arith.addf %15, %17 : vector<2x128xf32>
      %19 = arith.negf %18 : vector<2x128xf32>
      %20 = math.exp %19 : vector<2x128xf32>
      %cst_19 = arith.constant 1.000000e+00 : f32
      %21 = vector.broadcast %cst_19 : f32 to vector<2x128xf32>
      %22 = arith.addf %21, %20 : vector<2x128xf32>
      %23 = arith.divf %21, %22 : vector<2x128xf32>
      %c0_20 = arith.constant 0 : index
      %c0_21 = arith.constant 0 : index
      %24 = vector.load %arg5[%c0_20, %c0_21] : memref<2x128xf32, #tpu.memory_space<vmem>>, vector<2x128xf32>
      tpu.vector_store %arg5[%c0_20, %c0_21], %23 {strides = array<i32>} : memref<2x128xf32, #tpu.memory_space<vmem>>, vector<2x128xf32>,
    } else {
    }
    return
  }
  func.func @transform_0(%arg0: i32, %arg1: i32) -> (i32, i32, i32) {
    %c0_i32 = arith.constant 0 : i32
    %c0_i32_0 = arith.constant 0 : i32
    return %arg0, %c0_i32, %arg1 : i32, i32, i32
  }
  func.func @transform_1(%arg0: i32, %arg1: i32) -> (i32, i32) {
    %c0_i32 = arith.constant 0 : i32
    %c0_i32_0 = arith.constant 0 : i32
    %c0_i32_1 = arith.constant 0 : i32
    return %c0_i32, %c0_i32_0 : i32, i32
  }
  func.func @transform_2(%arg0: i32, %arg1: i32) -> (i32, i32) {
    %c0_i32 = arith.constant 0 : i32
    %c0_i32_0 = arith.constant 0 : i32
    %c0_i32_1 = arith.constant 0 : i32
    return %c0_i32, %c0_i32_0 : i32, i32
  }
  func.func @transform_3(%arg0: i32, %arg1: i32) -> (i32, i32) {
    %c0_i32 = arith.constant 0 : i32
    %c0_i32_0 = arith.constant 0 : i32
    return %arg0, %c0_i32 : i32, i32
  }
}

</mosaic_0001>

<bundles_post_ra>
// kernel: tpu_custom_call.1
= control target key start
LH: loop header
LB: loop body
LE: loop exit
PB: predicated region body
PF: predicated region fallthrough
CT: control target
= control target key end

     0   :  { %8 = vsyncpa [#allocation4], 0  ;;  %s838_s0 = inlined_call_operand.hbm [shape: f32[2,4,256], index: 0, kind: input, shape index: {}]   ;;  %s839_s1 = inlined_call_operand.hbm [shape: f32[4,128], index: 1, kind: input, shape index: {}]   ;;  %s840_s2 = inlined_call_operand.vmem [shape: f32[1,128], index: 2, kind: input, shape index: {}]   ;;  %s841_s3 = inlined_call_operand.hbm [shape: f32[2,128], index: 3, kind: output, shape index: {}]  }
   0x1   :  { %10 = vsyncpa [#allocation4 + $0x1], 0 }
   0x2   :  { %11 = vsyncpa [#allocation7], 0 }
   0x3   :  { %12 = vsyncpa [#allocation5], 0  ;;  %s704_s12 = smov 0   ;;  %s706_s13 = smov 0  }
   0x4   :  { %s708_s14 = smov 0   ;;  %s710_s15 = smov 0  }
   0x5   :  { %s712_s16 = smov 0   ;;  %s714_s17 = smov 0  }
   0x6 LB: > { %s428_s18 = sadd.s32 4294967295, %s673_s17   ;;  %s39_s19 = sadd.s32 1, %s661_s14  ;;  %s673_s17 = sphi %s714_s17, %s18_s17   ;;  %s669_s16 = sphi %s712_s16, %s856_s16   ;;  %s665_s15 = sphi %s710_s15, %s855_s15   ;;  %s661_s14 = sphi %s708_s14, %s854_s14   ;;  %s657_s13 = sphi %s706_s13, %s853_s13   ;;  %s653_s12 = sphi %s704_s12, %s852_s12  }
   0x7   : > { %p46_p0 = scmp.ne.s32.totalorder %s661_s14, %s657_s13  ;;  %p47_p1 = scmp.eq.s32.totalorder %s673_s17, 0 }
   0x8   : > { %p52_p2 = scmp.ne.s32.totalorder %s657_s13, %s653_s12  ;;  %p740_p3 = scmp.eq.s32.totalorder %s428_s18, 0 }
   0x9   : > { %p48_p4 = por %p47_p1, %p46_p0  ;;  %p429_p5 = scmp.ge.s32.totalorder %s673_s17, 1 }
   0xa   : > { %p747_p6 = por %p740_p3, %p52_p2  ;;  %p131_p7 = scmp.lt.s32.totalorder %s673_s17, 3 }
   0xb   : > { %s675_s23 = smov [#allocation6]   ;;  %p473_p10 = scmp.lt.s32.totalorder %s673_s17, 2 }
   0xc   : > { %s845_s21 = scalar_select %p747_p6, 1, 0 }
   0xd   : > { %p752_p8 = pnand %p429_p5, %p131_p7  ;;  %s144_s24 = sshll.u32 %s675_s23, 4  ;;  %s145_s24 = int_to_ptr.vmem [resolvable:$true] %s144_s24 }
   0xe   : > { %s158_s25 = sand.u32 1, %s661_s14   ;;  %p762_p12 = pnand %p473_p10, %p48_p4 }
   0xf   : > { %s846_s22 = scalar_select %p752_p8, 1, 0 }
  0x10   : > { %p464_p9 = pneg %p752_p8  ;;  %s548_s27 = scalar_lea.vmem %s145_s24, 64 }
  0x11   : > { %p549_p0 = scmp.ne.s32.totalorder %s145_s24, %s548_s27  ;;  %p556_p5 = scmp.lt.s32.totalorder %s145_s24, %s145_s24 }
  0x12   : > { %p465_p11 = pnand %p464_p9, %p740_p3  ;;  %p557_p7 = scmp.lt.s32.totalorder %s548_s27, %s548_s27 }
  0x14   : > { %p539_p13 = pneg %p465_p11  ;;  %p558_p6 = por %p557_p7, %p556_p5 }
  0x16   : > { %p551_p1 = pnand %p549_p0, %p539_p13 }
  0x18   : > { %p552_p2 = pneg %p551_p1 }
  0x1a   : > { %p559_p8 = pnand %p558_p6, %p552_p2 }
  0x1c   : > { %562 = shalt.err (!%p559_p8)
}
  0x1d   : > { %467 = dma.hbm_to_vmem [thread:$0]  (!%p465_p11), %s839_s1, 64, %s145_s24, [#allocation7]  }
  0x1e   : > { %s27_s30 = sadd.s32 1, %s669_s16  ;;  %s432_s4 = sshll.u32 %s158_s25, 3 }
  0x1f   : > { %p28_p4 = scmp.ge.s32.totalorder %s27_s30, 2  ;;  %s433_s5 = sshll.u32 %s669_s16, 6 }
  0x20   : > { %s162_s6 = scalar_lea.vmem [#allocation3], %s432_s4  ;;  %s170_s10 = scalar_lea.hbm %s838_s0, %s433_s5 }
  0x21   : > { %s171_s7 = sshll.u32 %s162_s6, 4  ;;  %s858_s30 = smov (%p28_p4, %s27_s30), 0  ;;  %s172_s7 = int_to_ptr.vmem [resolvable:$true] %s171_s7 }
  0x22   : > { %s35_s11 = ssub.s32 %s669_s16, %s858_s30  ;;  %s159_s23 = scalar_lea.sflag [#allocation4], %s158_s25 }
  0x23   : > { %p37_p6 = scmp.eq.s32.totalorder %s35_s11, 0  ;;  %p565_p8 = pneg %p762_p12 }
  0x24   : > { %s576_s24 = scalar_lea.vmem %s172_s7, 128  ;;  %s676_s27 = smov [#allocation3]  }
  0x25   : > { %s781_s12 = scalar_select %p37_p6, %s661_s14, %s39_s19  }
  0x26   : > { %p577_p9 = scmp.ne.s32.totalorder %s172_s7, %s576_s24  ;;  %s581_s28 = sshll.u32 %s676_s27, 4  ;;  %s582_s28 = int_to_ptr.vmem [resolvable:$false] %s581_s28 }
  0x27   : > { %s583_s29 = scalar_lea.vmem %s582_s28, 256  ;;  %p584_p13 = scmp.lt.s32.totalorder %s172_s7, %s582_s28 }
  0x28   : > { %p579_p10 = pnand %p577_p9, %p565_p8  ;;  %p585_p0 = scmp.lt.s32.totalorder %s583_s29, %s576_s24 }
  0x2a   : > { %p580_p11 = pneg %p579_p10  ;;  %p586_p1 = por %p585_p0, %p584_p13 }
  0x2c   : > { %p587_p2 = pnand %p586_p1, %p580_p11 }
  0x2e   : > { %590 = shalt.err (!%p587_p2)
}
  0x2f   : > { %s677_s4 = smov 128   ;;  %s678_s19 = smov 64  }
  0x30   : > { %s679_s5 = smov 4   ;;  %p848_p5 = scmp.ne.s32.totalorder %s846_s22, 0 }
  0x31   : > { %471 = dma.hbm_to_vmem [thread:$0]  (!%p762_p12), %s170_s10, 128, %s172_s7, %s159_s23, %s677_s4, %s678_s19, %s679_s5  }
  0x32   : > { %183 = sbr.rel (%p848_p5) target bundleno = 475 (0x1db), region = 32  ;;  %s185_s25 = sand.u32 (!%p848_p5), 1, %s657_s13  }
  0x33   : > { %s435_s6 = sshll.u32 (!%p848_p5), %s185_s25, 3  ;;  %s186_s8 = scalar_lea.sflag (!%p848_p5), [#allocation4], %s185_s25 }
  0x34   : > { %s189_s9 = scalar_lea.vmem (!%p848_p5), [#allocation3], %s435_s6  ;;  %p849_p7 = scmp.ne.s32.totalorder (!%p848_p5), %s845_s21, 0 }
  0x37   : > { %640 = dma.done.wait (%p849_p7), %s186_s8, 128  }
  0x38   : > { %642 = vsyncadd (%p849_p7), %s186_s8, 4294967168 }
  0x39   : > { %644 = dma.done.wait (%p740_p3), [#allocation7], 64  }
  0x3a   : > { %646 = vsyncadd (%p740_p3), [#allocation7], 4294967232  ;;  %p437_p12 = scmp.ne.s32.totalorder %s665_s15, 0 }
  0x3c   : > { %215 = sbr.rel (%p437_p12) target bundleno = 67 (0x43), region = 44 }
  0x41   : > { %v680_v0 = vmov 0.0  }
  0x42   : > { %216 = vst [vmem:[#allocation2] sm:$0xf] %v680_v0  ;;  %217 = vst [vmem:[#allocation2 + $0x4] sm:$0xf] %v680_v0 }
  0x43 PF: > { %v218_v1 = vld [vmem:[%s189_s9] sm:$0xf]  ;;  %v219_v3 = vld [vmem:[%s189_s9 + $0x4] sm:$0xf]  ;;  %p438_p4 = scmp.ne.s32.totalorder %s665_s15, 1 }
  0x48   : > { %229 = sbr.rel (%p438_p4) target bundleno = 460 (0x1cc), region = 48 }
  0x49   : > { %v220_v2 = vld [vmem:[#allocation2] sm:$0xf]  ;;  %v221_v5 = vld [vmem:[#allocation2 + $0x4] sm:$0xf] }
  0x4a   : > { %v222_v4 = vadd.f32 %v220_v2, %v218_v1  ;;  %v223_v6 = vadd.f32 %v221_v5, %v219_v3 }
  0x4c   : > { %224 = vst [vmem:[#allocation2] sm:$0xf] %v222_v4  ;;  %225 = vst [vmem:[#allocation2 + $0x4] sm:$0xf] %v223_v6 }
  0x4d   : > { %vm232_vm0 = vcmask 1043456   ;;  %v241_v11 = vld [vmem:[#allocation6] sm:$0xf]  ;;  %v681_v12 = vmov 0.0   ;;  %vm682_vm1 = vmmov 0   ;;  %v251_v13 = vlaneseq }
  0x4e   : > { %449 = vmatprep.subr.mxu0 %v681_v12  ;;  %451 = vmatprep.mubr.msk.f32.mxu0 %vm682_vm1, %v681_v12  ;;  %vm261_vm2 = vcmask 1041409   ;;  %vm263_vm3 = vcmask 31744   ;;  %v439_v24 = vld [vmem:[%s840_s2] ss:$0 sm:$0xff] }
  0x4f   : > { %450 = vmatpush3.msk.msra.mxu0 %vm232_vm0, %v241_v11  ;;  %v252_v14 = vand.u32 127, %v251_v13  ;;  %v254_v15 = vshrl.u32 %v251_v13, 7 }
  0x51   : > { %v255_v17 = vsub.s32 %v252_v14, %v254_v15 }
  0x53   : > { %v230_v7 = vld [vmem:[#allocation2] sm:$0xf]  ;;  %v231_v8 = vld [vmem:[#allocation2 + $0x4] sm:$0xf] }
  0x54   : > { %v233_v9 = vsel %vm232_vm0, %v230_v7, 0.0  ;;  %v236_v10 = vsel %vm232_vm0, %v231_v8, 0.0 }
  0x55   : > { %234 = vadd.xlane.f32.xlu0 %v233_v9 }
  0x59   : > { %237 = vadd.xlane.f32.xlu0 %v236_v10 }
  0xde   : > { %v235_v16 = vpop.xlane.xlu0 %234 }
  0xdf   : > { %v239_v18 = vmul.f32 0.00390625, %v235_v16 }
  0xe1   : > { %v256_v21 = vrot.slane %v239_v18, %v255_v17 }
  0xe2   : > { %v238_v19 = vpop.xlane.xlu0 %237 }
  0xe3   : > { %v240_v20 = vmul.f32 0.00390625, %v238_v19 }
  0xe5   : > { %v260_v22 = vrot.slane %v240_v20, %v255_v17 }
  0xe7   : > { %v262_v23 = vsel %vm261_vm2, %v260_v22, %v256_v21 }
  0xe8   : > { %452 = vmatmul.mubr.msk.f32.vlgmr.msra.gmra.mxu0 %vm263_vm3, %v262_v23 }
 0x1a8   : > { %v335_v25 = vpop.f32.mrf.mxu0 }
 0x1a9   : > { %v336_v26 = vadd.f32 %v439_v24, %v335_v25 }
 0x1aa   : > { %v453_v27 = vpop.f32.mrf.mxu0 }
 0x1ab   : > { %v442_v28 = vmul.f32 -1.442695, %v336_v26 }
 0x1ad   : > { %533 = vpow2.f32 %v442_v28 }
 0x1ba   : > { %v534_v29 = vpop.eup %533 }
 0x1bb   : > { %v342_v30 = vadd.f32 1.0, %v534_v29 }
 0x1bd   : > { %535 = vrcp.f32 %v342_v30 }
 0x1ca   : > { %v536_v31 = vpop.eup %535 }
 0x1cb   : > { %345 = vst [vmem:[#allocation8] sm:$0x3] %v536_v31 }
 0x1cc PF: > { %p805_p3 = scmp.eq.s32.totalorder %s428_s18, 1  ;;  %s683_s22 = smov [#allocation8]  }
 0x1cd   : > { %s355_s26 = sshll.u32 %s683_s22, 4  ;;  %s356_s26 = int_to_ptr.vmem [resolvable:$true] %s355_s26 }
 0x1ce   : > { %s591_s7 = scalar_lea.vmem %s356_s26, 32  ;;  %p598_p10 = scmp.lt.s32.totalorder %s356_s26, %s356_s26 }
 0x1cf   : > { %p592_p6 = scmp.ne.s32.totalorder %s356_s26, %s591_s7  ;;  %p599_p11 = scmp.lt.s32.totalorder %s591_s7, %s591_s7 }
 0x1d1   : > { %p593_p8 = pnand %p592_p6, %p805_p3  ;;  %p600_p13 = por %p599_p11, %p598_p10 }
 0x1d3   : > { %p594_p9 = pneg %p593_p8 }
 0x1d5   : > { %p601_p0 = pnand %p600_p13, %p594_p9 }
 0x1d7   : > { %604 = shalt.err (!%p601_p0)
}
 0x1d8   : > { %461 = dma.vmem_to_hbm [thread:$0]  (%p805_p3), %s356_s26, 32, %s841_s3, [#allocation5]  }
 0x1d9   : > { %648 = dma.done.wait (%p805_p3), [#allocation5], 32  }
 0x1da   : > { %650 = vsyncadd (%p805_p3), [#allocation5], 4294967264 }
 0x1db PF: > { %s18_s17 = sadd.s32 1, %s673_s17   ;;  %s851_s11 = smov %s781_s12 }
 0x1dc   : > { %p15_p1 = scmp.ge.s32.totalorder %s18_s17, 4   ;;  %s852_s12 = smov %s657_s13 }
 0x1dd   : > { %s853_s13 = smov %s661_s14  ;;  %s854_s14 = smov %s851_s11 }
 0x1de   : > { %s855_s15 = smov %s669_s16  ;;  %s856_s16 = smov %s858_s30 }
 0x1df   :  { %17 = sbr.rel (!%p15_p1) target bundleno = 6 (0x6), region = 82 }
 0x1e4   :  { %368 = vsyncpa [#allocation4], 1 }
 0x1e5   :  { %370 = vsyncpa [#allocation4 + $0x1], 1 }
 0x1e6   :  { %371 = vsyncpa [#allocation7], 1 }
 0x1e7   :  { %372 = vsyncpa [#allocation5], 1 }
 0x1e8   :  { %374 = vsyncpa [#allocation5 + $0x1], 1 }

</bundles_post_ra>
